<compile_context>
chip_gen: v7x
topology: tpu7x:2x2x1
jax: 0.10.0
libtpu: 0.0.40
codegen_flags: <defaults>
</compile_context>

<pallas_src>
import functools

import jax
import jax.numpy as jnp
from jax.experimental import pallas as pl
from jax.experimental.pallas import tpu as pltpu


def _round_up(x: int, m: int) -> int:
    return ((x + m - 1) // m) * m


def _node_embedding_kernel(x_ref, w_ref, b_ref, o_ref, acc_ref):
    """One (tile_m, tile_n) output tile, accumulated over the K grid axis."""
    k = pl.program_id(2)

    @pl.when(k == 0)
    def _init():
        acc_ref[...] = jnp.zeros_like(acc_ref)

    # MXU matmul with f32 accumulation.
    acc_ref[...] += jnp.dot(
        x_ref[...], w_ref[...], preferred_element_type=jnp.float32
    )

    @pl.when(k == pl.num_programs(2) - 1)
    def _finalize():
        o_ref[...] = (acc_ref[...] + b_ref[...].astype(jnp.float32)).astype(
            o_ref.dtype
        )


@functools.partial(jax.jit, static_argnames=("tile_m", "tile_n", "tile_k"))
def node_embedding(node_feats, weight, bias, *, tile_m=256, tile_n=512, tile_k=512):
    """node_feats: [M, in_feats]; weight: [in_feats, out_feats]; bias: [out_feats]."""
    M, K = node_feats.shape
    K2, N = weight.shape
    assert K == K2, "weight must be [in_feats, out_feats]"
    out_dtype = node_feats.dtype
    itemsize = jnp.dtype(out_dtype).itemsize

    # --- effective tiles & padded dims (sublane/lane aligned) ---------------
    # M: 16-row alignment covers both f32 (8) and bf16 (16) sublane packing.
    tile_m_eff = min(tile_m, _round_up(M, 16))
    m_pad = _round_up(M, tile_m_eff)
    # N: multiple of 128 -> lane-dense (unmasked) output stores.
    tile_n_eff = min(tile_n, _round_up(N, 128))
    n_pad = _round_up(N, tile_n_eff)
    # K: keep whole when small; otherwise 512-chunks (zero-padded).
    if K <= tile_k:
        tile_k_eff, k_pad = K, K
    else:
        tile_k_eff = tile_k
        k_pad = _round_up(K, tile_k_eff)

    # --- pad operands (zeros along K are exact; extra M/N rows are sliced off)
    x = node_feats
    if (m_pad, k_pad) != (M, K):
        x = jnp.pad(x, ((0, m_pad - M), (0, k_pad - K)))
    w = weight
    if (k_pad, n_pad) != (K, N):
        w = jnp.pad(w, ((0, k_pad - K), (0, n_pad - N)))
    b2d = bias.reshape(1, N)
    if n_pad != N:
        b2d = jnp.pad(b2d, ((0, 0), (0, n_pad - N)))

    grid = (m_pad // tile_m_eff, n_pad // tile_n_eff, k_pad // tile_k_eff)

    # --- VMEM budget (double-buffered inputs/output + f32 accumulator) ------
    vmem_bytes = (
        2 * (tile_m_eff * tile_k_eff + tile_k_eff * tile_n_eff
             + tile_m_eff * tile_n_eff + tile_n_eff) * itemsize
        + tile_m_eff * tile_n_eff * 4
    )
    vmem_limit = int(min(max(vmem_bytes + (8 << 20), 32 << 20), 48 << 20))

    cost = pl.CostEstimate(
        flops=2 * m_pad * k_pad * n_pad,
        transcendentals=0,
        bytes_accessed=itemsize * (m_pad * k_pad + k_pad * n_pad + m_pad * n_pad),
    )

    out_pad = pl.pallas_call(
        _node_embedding_kernel,
        out_shape=jax.ShapeDtypeStruct((m_pad, n_pad), out_dtype),
        grid_spec=pltpu.PrefetchScalarGridSpec(
            num_scalar_prefetch=0,
            grid=grid,
            in_specs=[
                # x row/K tile
                pl.BlockSpec((tile_m_eff, tile_k_eff), lambda i, j, k: (i, k)),
                # weight K/N tile (never fully resident)
                pl.BlockSpec((tile_k_eff, tile_n_eff), lambda i, j, k: (k, j)),
                # bias N tile
                pl.BlockSpec((1, tile_n_eff), lambda i, j, k: (0, j)),
            ],
            out_specs=pl.BlockSpec((tile_m_eff, tile_n_eff), lambda i, j, k: (i, j)),
            scratch_shapes=[pltpu.VMEM((tile_m_eff, tile_n_eff), jnp.float32)],
        ),
        compiler_params=pltpu.CompilerParams(
            dimension_semantics=("parallel", "parallel", "arbitrary"),
            vmem_limit_bytes=vmem_limit,
        ),
        cost_estimate=cost,
    )(x, w, b2d)

    # Strip padding.
    return out_pad[:M, :N]


if __name__ == "__main__":
    # Small shapes consistent with the module: num_nodes=16, in_feats=32, out_feats=64.
    num_nodes, in_feats, out_feats = 16, 32, 64

    key = jax.random.PRNGKey(0)
    kx, kw, kb = jax.random.split(key, 3)

    node_feats = jax.random.normal(kx, (num_nodes, in_feats), dtype=jnp.float32)
    # Deterministic parameter init (mimics nn.Linear's uniform(-1/sqrt(in), 1/sqrt(in))).
    bound = 1.0 / jnp.sqrt(jnp.float32(in_feats))
    weight = jax.random.uniform(kw, (in_feats, out_feats), jnp.float32, -bound, bound)
    bias = jax.random.uniform(kb, (out_feats,), jnp.float32, -bound, bound)

    out = node_embedding(node_feats, weight, bias)
    jax.block_until_ready(out)

    # Sanity check against plain-JAX reference of nn.Linear semantics.
    ref = node_feats @ weight + bias
    assert out.shape == (num_nodes, out_feats)
    assert jnp.allclose(out, ref, atol=1e-5, rtol=1e-5)

    print("KERNEL_OK")
</pallas_src>

<mosaic_0001>
module attributes {stable_mosaic.version = 11 : i64} {
  func.func @_node_embedding_kernel(%arg0: i32, %arg1: i32, %arg2: i32, %arg3: memref<16x32xf32, #tpu.memory_space<vmem>>, %arg4: memref<32x128xf32, #tpu.memory_space<vmem>>, %arg5: memref<1x128xf32, #tpu.memory_space<vmem>>, %arg6: memref<16x128xf32, #tpu.memory_space<vmem>>, %arg7: memref<16x128xf32, #tpu.memory_space<vmem>>) attributes {dimension_semantics = [#tpu.dimension_semantics<parallel>, #tpu.dimension_semantics<parallel>, #tpu.dimension_semantics<arbitrary>], iteration_bounds = array<i64: 1, 1, 1>, scalar_prefetch = 0 : i64, scratch_operands = 1 : i64, tpu.core_type = #tpu.core_type<tc>, window_params = [{transform_indices = @transform_0, window_bounds = array<i64: 16, 32>}, {transform_indices = @transform_1, window_bounds = array<i64: 32, 128>}, {transform_indices = @transform_2, window_bounds = array<i64: 1, 128>}, {transform_indices = @transform_3, window_bounds = array<i64: 16, 128>}]} {
    %c0_i32 = arith.constant 0 : i32
    %0 = arith.cmpi eq, %arg2, %c0_i32 : i32
    %1 = arith.extui %0 : i1 to i32
    %c0_i32_0 = arith.constant 0 : i32
    %2 = arith.cmpi ne, %1, %c0_i32_0 : i32
    scf.if %2 {
      %cst_10 = arith.constant 0.000000e+00 : f32
      %12 = vector.broadcast %cst_10 : f32 to vector<16x128xf32>
      %c0_11 = arith.constant 0 : index
      %c0_12 = arith.constant 0 : index
      %13 = vector.load %arg7[%c0_11, %c0_12] : memref<16x128xf32, #tpu.memory_space<vmem>>, vector<16x128xf32>
      tpu.vector_store %arg7[%c0_11, %c0_12], %12 {strides = array<i32>} : memref<16x128xf32, #tpu.memory_space<vmem>>, vector<16x128xf32>,
    } else {
    }
    %c0 = arith.constant 0 : index
    %c0_1 = arith.constant 0 : index
    %3 = vector.load %arg7[%c0, %c0_1] : memref<16x128xf32, #tpu.memory_space<vmem>>, vector<16x128xf32>
    %c0_2 = arith.constant 0 : index
    %c0_3 = arith.constant 0 : index
    %4 = vector.load %arg3[%c0_2, %c0_3] : memref<16x32xf32, #tpu.memory_space<vmem>>, vector<16x32xf32>
    %c0_4 = arith.constant 0 : index
    %c0_5 = arith.constant 0 : index
    %5 = vector.load %arg4[%c0_4, %c0_5] : memref<32x128xf32, #tpu.memory_space<vmem>>, vector<32x128xf32>
    %cst = arith.constant dense<0.000000e+00> : vector<16x128xf32>
    %6 = tpu.matmul %4, %5, %cst {dimension_numbers = #tpu.dot_dimension_numbers<[1], [0], [0], [1], [0, 0, 1, 1], [], []>} : vector<16x32xf32>, vector<32x128xf32>, vector<16x128xf32> -> vector<16x128xf32>
    %7 = arith.addf %3, %6 : vector<16x128xf32>
    %c0_6 = arith.constant 0 : index
    %c0_7 = arith.constant 0 : index
    %8 = vector.load %arg7[%c0_6, %c0_7] : memref<16x128xf32, #tpu.memory_space<vmem>>, vector<16x128xf32>
    tpu.vector_store %arg7[%c0_6, %c0_7], %7 {strides = array<i32>} : memref<16x128xf32, #tpu.memory_space<vmem>>, vector<16x128xf32>,
    %c0_i32_8 = arith.constant 0 : i32
    %9 = arith.cmpi eq, %arg2, %c0_i32_8 : i32
    %10 = arith.extui %9 : i1 to i32
    %c0_i32_9 = arith.constant 0 : i32
    %11 = arith.cmpi ne, %10, %c0_i32_9 : i32
    scf.if %11 {
      %c0_10 = arith.constant 0 : index
      %c0_11 = arith.constant 0 : index
      %12 = vector.load %arg7[%c0_10, %c0_11] : memref<16x128xf32, #tpu.memory_space<vmem>>, vector<16x128xf32>
      %c0_12 = arith.constant 0 : index
      %c0_13 = arith.constant 0 : index
      %13 = vector.load %arg5[%c0_12, %c0_13] : memref<1x128xf32, #tpu.memory_space<vmem>>, vector<1x128xf32>
      %14 = vector.broadcast %13 : vector<1x128xf32> to vector<16x128xf32>
      %15 = arith.addf %12, %14 : vector<16x128xf32>
      %c0_14 = arith.constant 0 : index
      %c0_15 = arith.constant 0 : index
      %16 = vector.load %arg6[%c0_14, %c0_15] : memref<16x128xf32, #tpu.memory_space<vmem>>, vector<16x128xf32>
      tpu.vector_store %arg6[%c0_14, %c0_15], %15 {strides = array<i32>} : memref<16x128xf32, #tpu.memory_space<vmem>>, vector<16x128xf32>,
    } else {
    }
    return
  }
  func.func @transform_0(%arg0: i32, %arg1: i32, %arg2: i32) -> (i32, i32) {
    %c0_i32 = arith.constant 0 : i32
    return %arg0, %arg2 : i32, i32
  }
  func.func @transform_1(%arg0: i32, %arg1: i32, %arg2: i32) -> (i32, i32) {
    %c0_i32 = arith.constant 0 : i32
    return %arg2, %arg1 : i32, i32
  }
  func.func @transform_2(%arg0: i32, %arg1: i32, %arg2: i32) -> (i32, i32) {
    %c0_i32 = arith.constant 0 : i32
    %c0_i32_0 = arith.constant 0 : i32
    return %c0_i32, %arg1 : i32, i32
  }
  func.func @transform_3(%arg0: i32, %arg1: i32, %arg2: i32) -> (i32, i32) {
    %c0_i32 = arith.constant 0 : i32
    return %arg0, %arg1 : i32, i32
  }
}

</mosaic_0001>

<bundles_post_ra>
// kernel: node_embedding.1
= control target key start
LH: loop header
LB: loop body
LE: loop exit
PB: predicated region body
PF: predicated region fallthrough
CT: control target
= control target key end

     0   :  { %vm29_vm0 = vcmask 261120   ;;  %s258_s0 = inlined_call_operand.vmem [shape: f32[16,32], index: 0, kind: input, shape index: {}]   ;;  %s259_s1 = inlined_call_operand.vmem [shape: f32[32,128], index: 1, kind: input, shape index: {}]   ;;  %s260_s2 = inlined_call_operand.vmem [shape: f32[1,128], index: 2, kind: input, shape index: {}]   ;;  %s261_s3 = inlined_call_operand.hbm [shape: f32[16,128], index: 3, kind: output, shape index: {}]  }
   0x1   :  { %v25_v0 = vld [vmem:[%s259_s1] sm:$0xff]  ;;  %v26_v1 = vld [vmem:[%s259_s1 + $0x8] sm:$0xff]  ;;  %v27_v2 = vld [vmem:[%s259_s1 + $0x10] sm:$0xff] }
   0x2   :  { %v167_v3 = vpack.c.bf16 %v26_v1, %v25_v0  ;;  %v28_v4 = vld [vmem:[%s259_s1 + $0x18] sm:$0xff]  ;;  %v23_v5 = vld [vmem:[%s258_s0] sm:$0xff] }
   0x3   :  { %v171_v6 = vpack.c.bf16 %v28_v4, %v27_v2  ;;  %164 = vmatprep.mubr.msk.f32.mxu0 %vm29_vm0, %v23_v5 }
   0x4   :  { %8 = vsyncpa [#allocation4], 0  ;;  %168 = vmatprep.subr.bf16.mxu0 %v167_v3  ;;  %v24_v7 = vld [vmem:[%s258_s0 + $0x8] sm:$0xff]  ;;  %v149_v8 = vld [vmem:[%s260_s2] ss:$0 sm:$0xff]  ;;  %s202_s1 = smov [#allocation3]  }
   0x5   :  { %170 = vmatpush3.bf16.msra.mxu0 %v167_v3  ;;  %s136_s26 = sshll.u32 %s202_s1, 4  ;;  %s137_s26 = int_to_ptr.vmem [resolvable:$true] %s136_s26 }
   0x6   :  { %172 = vmatprep.subr.bf16.mxu0 %v171_v6  ;;  %s178_s27 = scalar_lea.vmem %s137_s26, 256  ;;  %p183_p1 = scmp.lt.s32.totalorder %s137_s26, %s137_s26 }
   0x7   :  { %p179_p0 = scmp.ne.s32.totalorder %s137_s26, %s178_s27  ;;  %p184_p2 = scmp.lt.s32.totalorder %s178_s27, %s178_s27 }
   0x9   :  { %174 = vmatpush3.bf16.msra.mxu0 %v171_v6  ;;  %p185_p3 = por %p184_p2, %p183_p1 }
   0xb   :  { %p186_p4 = pnand %p185_p3, %p179_p0 }
   0xc   :  { %165 = vmatmul.mubr.msk.f32.vlgmr.msra.gmra.mrb[0].mxu0 %vm29_vm0, %v24_v7 }
  0xdf   :  { %v166_v9 = vpop.f32.mrb[0].mxu0 }
  0xe0   :  { %v128_v10 = vadd.f32 %v166_v9, %v149_v8  ;;  %v102_v11 = vpop.f32.mrb[1].mxu0 }
  0xe1   :  { %v127_v12 = vadd.f32 %v149_v8, %v102_v11 }
  0xe2   :  { %130 = vst [vmem:[#allocation3 + $0x8] sm:$0xff] %v128_v10 }
  0xe3   :  { %129 = vst [vmem:[#allocation3] sm:$0xff] %v127_v12 }
  0xe4   :  { %189 = shalt.err (!%p186_p4)
}
  0xe5   :  { %s190_s2 = scalar_lea.hbm %s261_s3, 256 }
  0xe6   :  { %p191_p5 = scmp.ne.s32.totalorder %s261_s3, %s190_s2  ;;  %p194_p6 = scmp.lt.u32.totalorder %s190_s2, %s261_s3 }
  0xe8   :  { %p196_p7 = pnand %p194_p6, %p191_p5 }
  0xea   :  { %199 = shalt.err (!%p196_p7)
}
  0xeb   :  { %s203_s6 = smov 128   ;;  %s204_s7 = smov 8  }
  0xec   :  { %142 = dma.vmem_to_hbm [thread:$0]  %s137_s26, 256, %s261_s3, [#allocation4], %s203_s6, %s203_s6, %s204_s7  }
  0xed   :  { %200 = dma.done.wait [#allocation4], 256  }
  0xee   :  { %201 = vsyncadd [#allocation4], 4294967040 }
  0xef   :  { %146 = vsyncpa [#allocation4], 1 }

</bundles_post_ra>
